<compile_context>
chip_gen: v7x
topology: tpu7x:2x2x1
jax: 0.10.0
libtpu: 0.0.40
codegen_flags: <defaults>
</compile_context>

<pallas_src>
import functools
import math

import jax
import jax.numpy as jnp
from jax.experimental import pallas as pl
from jax.experimental.pallas import tpu as pltpu

SELU_ALPHA = 1.6732632423543772848170429916717
SELU_SCALE = 1.0507009873554804934193349852946


@functools.lru_cache(maxsize=None)
def _vmem_limit():
    # v5e/v6e have 128 MiB physical VMEM -> 64 MiB scoped is safe; v7x has
    # 64 MiB -> cap at half.  Fallback is the conservative 32 MiB default.
    try:
        cap = pltpu.get_tpu_info().vmem_capacity_bytes
        return int(min(64 * 1024 * 1024, cap // 2))
    except Exception:
        return 32 * 1024 * 1024


def _pick_tile(dim, target, align):
    """Largest tile <= target that divides dim and respects alignment."""
    if dim <= target:
        return dim
    t = target
    while t >= align:
        if dim % t == 0:
            return t
        t //= 2
    # TODO(synk): pad `dim` up to a multiple of `align` in glue instead of
    # falling back to one full-dimension block (could bust VMEM on v7x).
    return dim


# ----------------------------- Pallas kernels ------------------------------

def _ln_core(x, g, b, eps):
    mean = jnp.mean(x, axis=-1, keepdims=True)
    cen = x - mean
    var = jnp.mean(cen * cen, axis=-1, keepdims=True)
    inv = jax.lax.rsqrt(var + eps)
    return cen * inv * g + b


def _epilogue(y, activation):
    if activation == "gelu":
        # TODO(synk): tanh-approx GELU (HF 'gelu_new'); exact erf-GELU differs slightly.
        c = math.sqrt(2.0 / math.pi)
        y = 0.5 * y * (1.0 + jnp.tanh(c * (y + 0.044715 * y * y * y)))
    elif activation == "tanh":
        y = jnp.tanh(y)
    return y


def _linear_kernel(x_ref, w_ref, b_ref, *rest, activation, fuse_ln, ln_eps):
    if fuse_ln:
        r_ref, g_ref, b2_ref, o_ref, acc_ref = rest
    else:
        o_ref, acc_ref = rest

    @pl.when(pl.program_id(2) == 0)
    def _():
        # Initialize the accumulator with the (broadcast) bias: drops the
        # separate f32 bias add in the finalize.
        acc_ref[...] = jnp.broadcast_to(b_ref[...].astype(jnp.float32),
                                        acc_ref.shape)

    x = x_ref[...]
    w = w_ref[...]
    if x.dtype != jnp.bfloat16:
        x = x.astype(jnp.bfloat16)       # in-kernel cast, no extra HBM pass
    if w.dtype != jnp.bfloat16:
        w = w.astype(jnp.bfloat16)
    acc_ref[...] += jnp.dot(x, w, preferred_element_type=jnp.float32)

    @pl.when(pl.program_id(2) == pl.num_programs(2) - 1)
    def _():
        y = acc_ref[...]
        if fuse_ln:
            y = y + r_ref[...].astype(jnp.float32)
            y = _ln_core(y,
                         g_ref[...].astype(jnp.float32),
                         b2_ref[...].astype(jnp.float32),
                         ln_eps)
        else:
            y = _epilogue(y, activation)
        o_ref[...] = y.astype(o_ref.dtype)


def pallas_linear(x, w, b, activation=None, out_dtype=jnp.float32,
                  residual=None, ln_gamma=None, ln_beta=None, ln_eps=1e-12):
    """y = act(x @ w + b)   or, with residual:  LN(x @ w + b + residual)."""
    M, K = x.shape
    N = w.shape[1]
    fuse_ln = residual is not None

    tm = _pick_tile(M, 512, 8)
    tn = N if (fuse_ln or N <= 1024) else _pick_tile(N, 1024, 128)
    tk = _pick_tile(K, 4096, 128)       # full K up to 4096 -> single k step
    grid = (M // tm, N // tn, K // tk)

    b = b.astype(jnp.float32).reshape(1, N)

    w_spec = pl.BlockSpec((tk, tn), lambda i, j, k: (k, j))
    if K // tk > 1:
        # Deeper weight buffering hides DMA behind the MXU on bandwidth-poor v5e.
        w_spec = pl.BlockSpec((tk, tn), lambda i, j, k: (k, j),
                              pipeline_mode=pl.Buffered(3))

    in_specs = [pl.BlockSpec((tm, tk), lambda i, j, k: (i, k)),
                w_spec,
                pl.BlockSpec((1, tn), lambda i, j, k: (0, j))]
    args = [x, w, b]
    if fuse_ln:
        in_specs += [pl.BlockSpec((tm, tn), lambda i, j, k: (i, j)),
                     pl.BlockSpec((1, tn), lambda i, j, k: (0, j)),
                     pl.BlockSpec((1, tn), lambda i, j, k: (0, j))]
        args += [residual, ln_gamma.reshape(1, N).astype(jnp.float32),
                 ln_beta.reshape(1, N).astype(jnp.float32)]

    kernel = functools.partial(_linear_kernel, activation=activation,
                               fuse_ln=fuse_ln, ln_eps=ln_eps)
    return pl.pallas_call(
        kernel,
        out_shape=jax.ShapeDtypeStruct((M, N), out_dtype),
        grid=grid,
        in_specs=in_specs,
        out_specs=pl.BlockSpec((tm, tn), lambda i, j, k: (i, j)),
        scratch_shapes=[pltpu.VMEM((tm, tn), jnp.float32)],
        compiler_params=pltpu.CompilerParams(
            dimension_semantics=("parallel", "parallel", "arbitrary"),
            vmem_limit_bytes=_vmem_limit()),
    )(*args)


def _layernorm_kernel(x_ref, g_ref, b_ref, o_ref, *, eps):
    x = x_ref[...].astype(jnp.float32)
    o_ref[...] = _ln_core(x, g_ref[...], b_ref[...], eps).astype(o_ref.dtype)


def pallas_layernorm(x, gamma, beta, eps=1e-12, out_dtype=jnp.bfloat16):
    M, H = x.shape
    tm = _pick_tile(M, 512, 8)
    row_spec = pl.BlockSpec((tm, H), lambda i: (i, 0))
    vec_spec = pl.BlockSpec((1, H), lambda i: (0, 0))
    kernel = functools.partial(_layernorm_kernel, eps=eps)
    return pl.pallas_call(
        kernel,
        out_shape=jax.ShapeDtypeStruct((M, H), out_dtype),
        grid=(M // tm,),
        in_specs=[row_spec, vec_spec, vec_spec],
        out_specs=row_spec,
        compiler_params=pltpu.CompilerParams(
            dimension_semantics=("parallel",),
            vmem_limit_bytes=_vmem_limit()),
    )(x, gamma.reshape(1, H).astype(jnp.float32),
      beta.reshape(1, H).astype(jnp.float32))


def _attn_heads(q, k, v, m, o_ref, heads, dh, o_lane0):
    """Per-head softmax(QK^T + m) V, stored straight into o_ref lane slices."""
    for h in range(heads):
        lo = h * dh
        qh = q[:, lo:lo + dh]
        kh = k[:, lo:lo + dh]
        vh = v[:, lo:lo + dh]
        s = jax.lax.dot_general(qh, kh, (((1,), (1,)), ((), ())),
                                preferred_element_type=jnp.float32)
        s = s + m
        s = s - jnp.max(s, axis=-1, keepdims=True)
        p = jnp.exp(s)
        p = p * pl.reciprocal(jnp.sum(p, axis=-1, keepdims=True), approx=True)
        out = jnp.dot(p.astype(vh.dtype), vh, preferred_element_type=jnp.float32)
        o_ref[0, :, pl.ds(o_lane0 + lo, dh)] = out.astype(o_ref.dtype)


def _attn_group_kernel(q_ref, k_ref, v_ref, m_ref, o_ref, *, scale, heads, dh):
    # One (batch, head-group) tile per step; q scaled once for the whole group.
    q = q_ref[0] * scale                # (S, group) bf16
    _attn_heads(q, k_ref[0], v_ref[0], m_ref[0], o_ref, heads, dh, 0)


def _attn_full_kernel(qkv_ref, m_ref, o_ref, *, scale, n_heads, dh, hidden):
    qkv = qkv_ref[0]                    # (S, 3H) bf16
    q = qkv[:, :hidden] * scale
    k = qkv[:, hidden:2 * hidden]
    v = qkv[:, 2 * hidden:]
    _attn_heads(q, k, v, m_ref[0], o_ref, n_heads, dh, 0)


def pallas_attention(qkv, mask_add, scale, n_heads):
    """qkv: (B, S, 3H) fused projections; returns (B, S, H) bf16 context."""
    # TODO(synk): switch to a flash-style KV-tiled kernel for long sequences
    # (here the full (S,S) score tile per head fits VMEM comfortably).
    B, S, H3 = qkv.shape
    H = H3 // 3
    dh = H // n_heads
    mask_add = mask_add.astype(jnp.float32)
    qkv = qkv if qkv.dtype == jnp.bfloat16 else qkv.astype(jnp.bfloat16)

    if H % 128 == 0 and 128 % dh == 0:
        # Lane-blocked path: 128-lane head groups, (batch, group) grid so v7x's
        # two TensorCores are busy even at small batch.
        hpg = 128 // dh
        nb = H // 128                    # number of 128-lane groups
        kernel = functools.partial(_attn_group_kernel, scale=scale,
                                   heads=hpg, dh=dh)
        q_spec = pl.BlockSpec((1, S, 128), lambda b, g: (b, 0, g))
        k_spec = pl.BlockSpec((1, S, 128), lambda b, g: (b, 0, g + nb))
        v_spec = pl.BlockSpec((1, S, 128), lambda b, g: (b, 0, g + 2 * nb))
        m_spec = pl.BlockSpec((1, 1, S), lambda b, g: (b, 0, 0))
        o_spec = pl.BlockSpec((1, S, 128), lambda b, g: (b, 0, g))
        return pl.pallas_call(
            kernel,
            out_shape=jax.ShapeDtypeStruct((B, S, H), jnp.bfloat16),
            grid=(B, nb),
            in_specs=[q_spec, k_spec, v_spec, m_spec],
            out_specs=o_spec,
            compiler_params=pltpu.CompilerParams(
                dimension_semantics=("parallel", "parallel"),
                vmem_limit_bytes=_vmem_limit()),
        )(qkv, qkv, qkv, mask_add)

    # Fallback for small / unaligned hidden sizes: one batch element per step.
    kernel = functools.partial(_attn_full_kernel, scale=scale,
                               n_heads=n_heads, dh=dh, hidden=H)
    return pl.pallas_call(
        kernel,
        out_shape=jax.ShapeDtypeStruct((B, S, H), jnp.bfloat16),
        grid=(B,),
        in_specs=[pl.BlockSpec((1, S, 3 * H), lambda b: (b, 0, 0)),
                  pl.BlockSpec((1, 1, S), lambda b: (b, 0, 0))],
        out_specs=pl.BlockSpec((1, S, H), lambda b: (b, 0, 0)),
        compiler_params=pltpu.CompilerParams(
            dimension_semantics=("parallel",),
            vmem_limit_bytes=_vmem_limit()),
    )(qkv, mask_add)


def _pooler_head_kernel(cls_ref, pw_ref, pb_ref, aw_ref, ab_ref, o_ref):
    cls = cls_ref[...]
    if cls.dtype != jnp.bfloat16:
        cls = cls.astype(jnp.bfloat16)
    pooled = jnp.tanh(jnp.dot(cls, pw_ref[...],
                              preferred_element_type=jnp.float32) + pb_ref[...])
    y = jnp.dot(pooled.astype(jnp.bfloat16), aw_ref[...],
                preferred_element_type=jnp.float32) + ab_ref[...]
    # (selu(y) + 1.5) / 3  (exp clamped so the dead where-branch can't overflow)
    selu = SELU_SCALE * jnp.where(
        y > 0, y, SELU_ALPHA * (jnp.exp(jnp.minimum(y, 0.0)) - 1.0))
    o_ref[...] = ((selu + 1.5) / 3.0).astype(o_ref.dtype)


def pallas_pooler_head(cls, pool_w, pool_b, asp_w, asp_b):
    """Fused BERT pooler (tanh) + aspect head ((selu+1.5)/3) — one launch."""
    B, H = cls.shape
    L = asp_w.shape[1]
    return pl.pallas_call(
        _pooler_head_kernel,
        out_shape=jax.ShapeDtypeStruct((B, L), jnp.float32),
        grid=(1,),
        in_specs=[pl.BlockSpec((B, H), lambda i: (0, 0)),
                  pl.BlockSpec((H, H), lambda i: (0, 0)),
                  pl.BlockSpec((1, H), lambda i: (0, 0)),
                  pl.BlockSpec((H, L), lambda i: (0, 0)),
                  pl.BlockSpec((1, L), lambda i: (0, 0))],
        out_specs=pl.BlockSpec((B, L), lambda i: (0, 0)),
        compiler_params=pltpu.CompilerParams(vmem_limit_bytes=_vmem_limit()),
    )(cls, pool_w, pool_b.astype(jnp.float32).reshape(1, H),
      asp_w, asp_b.astype(jnp.float32).reshape(1, L))


# ------------------------------ Model (glue) --------------------------------

def init_params(key, cfg):
    H, I, L = cfg["hidden"], cfg["intermediate"], cfg["labels"]
    keys = jax.random.split(key, 5 + cfg["layers"])

    def dense(k, fi, fo):
        kw, kb = jax.random.split(k)
        return (jax.random.normal(kw, (fi, fo), jnp.float32) * 0.02,
                jax.random.normal(kb, (fo,), jnp.float32) * 0.02)

    params = {
        "word_emb": jax.random.normal(keys[0], (cfg["vocab"], H), jnp.float32) * 0.02,
        "pos_emb": jax.random.normal(keys[1], (cfg["max_pos"], H), jnp.float32) * 0.02,
        "type_emb": jax.random.normal(keys[2], (2, H), jnp.float32) * 0.02,
        "emb_ln_g": jnp.ones((H,), jnp.float32),
        "emb_ln_b": jnp.zeros((H,), jnp.float32),
    }
    pw, pb = dense(keys[3], H, H)
    aw, ab = dense(keys[4], H, L)
    params["pool_w"], params["pool_b"] = pw.astype(jnp.bfloat16), pb
    params["asp_w"], params["asp_b"] = aw.astype(jnp.bfloat16), ab

    layers = []
    for li in range(cfg["layers"]):
        lk = jax.random.split(keys[5 + li], 6)
        wq, bq = dense(lk[0], H, H)
        wk, bk = dense(lk[1], H, H)
        wv, bv = dense(lk[2], H, H)
        wo, bo = dense(lk[3], H, H)
        wi, bi = dense(lk[4], H, I)
        wo2, bo2 = dense(lk[5], I, H)
        layers.append(dict(
            # fused QKV projection weight (H, 3H); bf16 weights / f32 biases
            wqkv=jnp.concatenate([wq, wk, wv], axis=1).astype(jnp.bfloat16),
            bqkv=jnp.concatenate([bq, bk, bv], axis=0),
            wo=wo.astype(jnp.bfloat16), bo=bo,
            wi=wi.astype(jnp.bfloat16), bi=bi,
            wo2=wo2.astype(jnp.bfloat16), bo2=bo2,
            ln1_g=jnp.ones((H,), jnp.float32), ln1_b=jnp.zeros((H,), jnp.float32),
            ln2_g=jnp.ones((H,), jnp.float32), ln2_b=jnp.zeros((H,), jnp.float32)))
    params["layers"] = layers
    return params


def comment_sentiment_forward(params, input_ids, attention_mask, cfg):
    B, S = input_ids.shape
    H = cfg["hidden"]
    nH = cfg["heads"]
    dh = H // nH

    # --- BERT embeddings (gather is glue; LayerNorm in Pallas, emits bf16) ---
    # TODO(synk): token_type is hard-coded to segment 0 (matches single-segment use).
    x = (jnp.take(params["word_emb"], input_ids, axis=0)
         + params["pos_emb"][:S][None, :, :]
         + params["type_emb"][0][None, None, :])
    x2d = pallas_layernorm(x.reshape(B * S, H),
                           params["emb_ln_g"], params["emb_ln_b"],
                           out_dtype=jnp.bfloat16)

    # HF-style additive attention mask, (B, 1, S)
    mask_b = ((1.0 - attention_mask.astype(jnp.float32)) * -10000.0)[:, None, :]
    scale = 1.0 / math.sqrt(dh)

    # --- Transformer encoder layers ---
    for lyr in params["layers"]:
        qkv = pallas_linear(x2d, lyr["wqkv"], lyr["bqkv"],
                            out_dtype=jnp.bfloat16)            # (B*S, 3H) bf16
        ctx = pallas_attention(qkv.reshape(B, S, 3 * H), mask_b, scale, nH)
        # attention-output projection with fused residual-add + LayerNorm
        x2d = pallas_linear(ctx.reshape(B * S, H), lyr["wo"], lyr["bo"],
                            out_dtype=jnp.bfloat16,
                            residual=x2d, ln_gamma=lyr["ln1_g"],
                            ln_beta=lyr["ln1_b"])
        ffn = pallas_linear(x2d, lyr["wi"], lyr["bi"], activation="gelu",
                            out_dtype=jnp.bfloat16)
        x2d = pallas_linear(ffn, lyr["wo2"], lyr["bo2"],
                            out_dtype=jnp.bfloat16,
                            residual=x2d, ln_gamma=lyr["ln2_g"],
                            ln_beta=lyr["ln2_b"])

    # --- Pooler (tanh) + aspect head ((selu + 1.5) / 3), one fused kernel ---
    cls = x2d.reshape(B, S, H)[:, 0, :]
    scores = pallas_pooler_head(cls, params["pool_w"], params["pool_b"],
                                params["asp_w"], params["asp_b"])
    return scores


# ----------------------------------- main ------------------------------------

if __name__ == "__main__":
    cfg = dict(hidden=128, heads=2, intermediate=256, layers=2,
               vocab=100, max_pos=16, labels=8)

    key = jax.random.PRNGKey(0)
    pkey, ikey = jax.random.split(key)
    params = init_params(pkey, cfg)

    B, S = 2, 8
    input_ids = jax.random.randint(ikey, (B, S), 0, cfg["vocab"], dtype=jnp.int32)
    attention_mask = jnp.array([[1, 1, 1, 1, 1, 1, 1, 1],
                                [1, 1, 1, 1, 1, 0, 0, 0]], dtype=jnp.int32)

    out = comment_sentiment_forward(params, input_ids, attention_mask, cfg)
    out = jax.block_until_ready(out)
    assert out.shape == (B, cfg["labels"]) and out.dtype == jnp.float32
    assert bool(jnp.all(jnp.isfinite(out)))
    print("KERNEL_OK")
</pallas_src>

<mosaic_0001>
module attributes {stable_mosaic.version = 11 : i64} {
  func.func @_layernorm_kernel(%arg0: i32, %arg1: memref<16x128xf32, #tpu.memory_space<vmem>>, %arg2: memref<1x128xf32, #tpu.memory_space<vmem>>, %arg3: memref<1x128xf32, #tpu.memory_space<vmem>>, %arg4: memref<16x128xbf16, #tpu.memory_space<vmem>>) attributes {dimension_semantics = [#tpu.dimension_semantics<parallel>], iteration_bounds = array<i64: 1>, scalar_prefetch = 0 : i64, scratch_operands = 0 : i64, tpu.core_type = #tpu.core_type<tc>, window_params = [{transform_indices = @transform_0, window_bounds = array<i64: 16, 128>}, {pipeline_mode = #tpu.pipeline_mode<synchronous>, transform_indices = @transform_1, window_bounds = array<i64: 1, 128>}, {pipeline_mode = #tpu.pipeline_mode<synchronous>, transform_indices = @transform_2, window_bounds = array<i64: 1, 128>}, {transform_indices = @transform_3, window_bounds = array<i64: 16, 128>}]} {
    %c0 = arith.constant 0 : index
    %c0_0 = arith.constant 0 : index
    %0 = vector.load %arg1[%c0, %c0_0] : memref<16x128xf32, #tpu.memory_space<vmem>>, vector<16x128xf32>
    %c0_1 = arith.constant 0 : index
    %c0_2 = arith.constant 0 : index
    %1 = vector.load %arg2[%c0_1, %c0_2] : memref<1x128xf32, #tpu.memory_space<vmem>>, vector<1x128xf32>
    %c0_3 = arith.constant 0 : index
    %c0_4 = arith.constant 0 : index
    %2 = vector.load %arg3[%c0_3, %c0_4] : memref<1x128xf32, #tpu.memory_space<vmem>>, vector<1x128xf32>
    %cst = arith.constant dense<0.000000e+00> : vector<16xf32>
    %3 = vector.multi_reduction <add>, %0, %cst [1] : vector<16x128xf32> to vector<16xf32>
    %4 = vector.shape_cast %3 : vector<16xf32> to vector<16x1xf32>
    %cst_5 = arith.constant 1.280000e+02 : f32
    %5 = vector.broadcast %cst_5 : f32 to vector<16x1xf32>
    %6 = arith.divf %4, %5 : vector<16x1xf32>
    %7 = vector.broadcast %6 : vector<16x1xf32> to vector<16x128xf32>
    %8 = arith.subf %0, %7 : vector<16x128xf32>
    %9 = arith.mulf %8, %8 : vector<16x128xf32>
    %cst_6 = arith.constant dense<0.000000e+00> : vector<16xf32>
    %10 = vector.multi_reduction <add>, %9, %cst_6 [1] : vector<16x128xf32> to vector<16xf32>
    %11 = vector.shape_cast %10 : vector<16xf32> to vector<16x1xf32>
    %cst_7 = arith.constant 1.280000e+02 : f32
    %12 = vector.broadcast %cst_7 : f32 to vector<16x1xf32>
    %13 = arith.divf %11, %12 : vector<16x1xf32>
    %cst_8 = arith.constant 9.99999996E-13 : f32
    %14 = vector.broadcast %cst_8 : f32 to vector<16x1xf32>
    %15 = arith.addf %13, %14 : vector<16x1xf32>
    %16 = math.rsqrt %15 : vector<16x1xf32>
    %17 = vector.broadcast %16 : vector<16x1xf32> to vector<16x128xf32>
    %18 = arith.mulf %8, %17 : vector<16x128xf32>
    %19 = vector.broadcast %1 : vector<1x128xf32> to vector<16x128xf32>
    %20 = arith.mulf %18, %19 : vector<16x128xf32>
    %21 = vector.broadcast %2 : vector<1x128xf32> to vector<16x128xf32>
    %22 = arith.addf %20, %21 : vector<16x128xf32>
    %23 = arith.truncf %22 : vector<16x128xf32> to vector<16x128xbf16>
    %c0_9 = arith.constant 0 : index
    %c0_10 = arith.constant 0 : index
    %24 = vector.load %arg4[%c0_9, %c0_10] : memref<16x128xbf16, #tpu.memory_space<vmem>>, vector<16x128xbf16>
    tpu.vector_store %arg4[%c0_9, %c0_10], %23 {strides = array<i32>} : memref<16x128xbf16, #tpu.memory_space<vmem>>, vector<16x128xbf16>,
    return
  }
  func.func @transform_0(%arg0: i32) -> (i32, i32) {
    %c0_i32 = arith.constant 0 : i32
    %c0_i32_0 = arith.constant 0 : i32
    return %arg0, %c0_i32 : i32, i32
  }
  func.func @transform_1(%arg0: i32) -> (i32, i32) {
    %c0_i32 = arith.constant 0 : i32
    %c0_i32_0 = arith.constant 0 : i32
    %c0_i32_1 = arith.constant 0 : i32
    return %c0_i32, %c0_i32_0 : i32, i32
  }
  func.func @transform_2(%arg0: i32) -> (i32, i32) {
    %c0_i32 = arith.constant 0 : i32
    %c0_i32_0 = arith.constant 0 : i32
    %c0_i32_1 = arith.constant 0 : i32
    return %c0_i32, %c0_i32_0 : i32, i32
  }
  func.func @transform_3(%arg0: i32) -> (i32, i32) {
    %c0_i32 = arith.constant 0 : i32
    %c0_i32_0 = arith.constant 0 : i32
    return %arg0, %c0_i32 : i32, i32
  }
}

</mosaic_0001>

<bundles_post_ra>
// kernel: tpu_custom_call.1
= control target key start
LH: loop header
LB: loop body
LE: loop exit
PB: predicated region body
PF: predicated region fallthrough
CT: control target
= control target key end

     0   :  { %8 = vsyncpa [#allocation3], 0  ;;  %s224_s0 = inlined_call_operand.hbm [shape: f32[16,128], index: 0, kind: input, shape index: {}]   ;;  %s225_s1 = inlined_call_operand.vmem [shape: f32[1,128], index: 1, kind: input, shape index: {}]   ;;  %s226_s2 = inlined_call_operand.vmem [shape: f32[1,128], index: 2, kind: input, shape index: {}]   ;;  %s227_s3 = inlined_call_operand.hbm [shape: bf16[16,128], index: 3, kind: output, shape index: {}]  }
   0x1   :  { %9 = vsyncpa [#allocation4], 0  ;;  %s168_s12 = smov [#allocation2]   ;;  %s120_s16 = scalar_lea.hbm %s224_s0, 256 }
   0x2   :  { %s15_s13 = sshll.u32 %s168_s12, 4  ;;  %p121_p0 = scmp.ne.s32.totalorder %s224_s0, %s120_s16  ;;  %s16_s13 = int_to_ptr.vmem [resolvable:$true] %s15_s13 }
   0x3   :  { %p124_p1 = scmp.lt.u32.totalorder %s120_s16, %s224_s0 }
   0x5   :  { %p126_p2 = pnand %p124_p1, %p121_p0 }
   0x7   :  { %129 = shalt.err (!%p126_p2)
}
   0x8   :  { %s130_s21 = scalar_lea.vmem %s16_s13, 256  ;;  %p135_p4 = scmp.lt.s32.totalorder %s16_s13, %s16_s13 }
   0x9   :  { %p131_p3 = scmp.ne.s32.totalorder %s16_s13, %s130_s21  ;;  %p136_p5 = scmp.lt.s32.totalorder %s130_s21, %s130_s21 }
   0xb   :  { %p137_p6 = por %p136_p5, %p135_p4 }
   0xd   :  { %p138_p7 = pnand %p137_p6, %p131_p3 }
   0xf   :  { %141 = shalt.err (!%p138_p7)
}
  0x10   :  { %s169_s22 = smov 128   ;;  %s170_s23 = smov 8  }
  0x11   :  { %21 = dma.hbm_to_vmem [thread:$0]  %s224_s0, 256, %s16_s13, [#allocation3], %s169_s22, %s169_s22, %s170_s23  }
  0x12   :  { %164 = dma.done.wait [#allocation3], 256  }
  0x13   :  { %165 = vsyncadd [#allocation3], 4294967040  ;;  %v29_v0 = vld [vmem:[#allocation2] sm:$0xff]  ;;  %v30_v1 = vld [vmem:[#allocation2 + $0x8] sm:$0xff]  ;;  %s171_s29 = smov [#allocation5]  }
  0x14   :  { %33 = vadd.xlane.f32.xlu0 %v29_v0  ;;  %v99_v18 = vld [vmem:[%s225_s1] ss:$0 sm:$0xff]  ;;  %s87_s30 = sshll.u32 %s171_s29, 4  ;;  %s88_s30 = int_to_ptr.vmem [resolvable:$true] %s87_s30 }
  0x15   :  { %v100_v22 = vld [vmem:[%s226_s2] ss:$0 sm:$0xff]  ;;  %s142_s4 = scalar_lea.vmem %s88_s30, 128  ;;  %p147_p9 = scmp.lt.s32.totalorder %s88_s30, %s88_s30 }
  0x16   :  { %p143_p8 = scmp.ne.s32.totalorder %s88_s30, %s142_s4  ;;  %p148_p10 = scmp.lt.s32.totalorder %s142_s4, %s142_s4 }
  0x18   :  { %35 = vadd.xlane.f32.xlu0 %v30_v1  ;;  %p149_p11 = por %p148_p10, %p147_p9 }
  0x1a   :  { %p150_p12 = pnand %p149_p11, %p143_p8 }
  0xa1   :  { %v34_v2 = vpop.xlane.xlu0 %33 }
  0xa2   :  { %v38_v3 = vmul.f32 0.0078125, %v34_v2 }
  0xa4   :  { %v40_v4 = vsub.f32 %v29_v0, %v38_v3 }
  0xa5   :  { %v36_v5 = vpop.xlane.xlu0 %35 }
  0xa6   :  { %v39_v6 = vmul.f32 0.0078125, %v36_v5  ;;  %v42_v7 = vmul.f32 %v40_v4, %v40_v4 }
  0xa8   :  { %v41_v8 = vsub.f32 %v30_v1, %v39_v6  ;;  %44 = vadd.xlane.f32.xlu1 %v42_v7 }
  0xaa   :  { %v43_v9 = vmul.f32 %v41_v8, %v41_v8 }
  0xac   :  { %46 = vadd.xlane.f32.xlu1 %v43_v9 }
 0x135   :  { %v45_v10 = vpop.xlane.xlu1 %44 }
 0x136   :  { %v48_v11 = vmul.f32 0.0078125, %v45_v10 }
 0x138   :  { %v50_v12 = vadd.f32 1e-12, %v48_v11 }
 0x139   :  { %v47_v13 = vpop.xlane.xlu1 %46 }
 0x13a   :  { %116 = vrsqrt.f32 %v50_v12  ;;  %v49_v14 = vmul.f32 0.0078125, %v47_v13 }
 0x13c   :  { %v51_v15 = vadd.f32 1e-12, %v49_v14 }
 0x13e   :  { %118 = vrsqrt.f32 %v51_v15 }
 0x144   :  { %v117_v16 = vpop.eup %116 }
 0x145   :  { %v54_v17 = vmul.f32 %v117_v16, %v40_v4 }
 0x147   :  { %v62_v21 = vmul.f32 %v99_v18, %v54_v17 }
 0x148   :  { %v119_v19 = vpop.eup %118 }
 0x149   :  { %v55_v20 = vmul.f32 %v119_v19, %v41_v8  ;;  %v70_v24 = vadd.f32 %v100_v22, %v62_v21 }
 0x14b   :  { %v63_v23 = vmul.f32 %v99_v18, %v55_v20 }
 0x14d   :  { %v71_v25 = vadd.f32 %v100_v22, %v63_v23 }
 0x14f   :  { %v108_v26 = vpack.c.bf16 %v71_v25, %v70_v24 }
 0x151   :  { %109 = vst [vmem:[#allocation5] sm:$0xff] %v108_v26  }
 0x152   :  { %153 = shalt.err (!%p150_p12)
}
 0x153   :  { %s154_s6 = scalar_lea.hbm %s227_s3, 128 }
 0x154   :  { %p155_p13 = scmp.ne.s32.totalorder %s227_s3, %s154_s6  ;;  %p158_p0 = scmp.lt.u32.totalorder %s154_s6, %s227_s3 }
 0x156   :  { %p160_p1 = pnand %p158_p0, %p155_p13 }
 0x158   :  { %163 = shalt.err (!%p160_p1)
}
 0x159   :  { %s172_s10 = smov 64   ;;  %s173_s11 = smov 4  }
 0x15a   :  { %93 = dma.vmem_to_hbm [thread:$0]  %s88_s30, 128, %s227_s3, [#allocation4], %s172_s10, %s172_s10, %s173_s11  }
 0x15b   :  { %166 = dma.done.wait [#allocation4], 128  }
 0x15c   :  { %167 = vsyncadd [#allocation4], 4294967168 }
 0x15d   :  { %97 = vsyncpa [#allocation3], 1 }
 0x15e   :  { %98 = vsyncpa [#allocation4], 1 }

</bundles_post_ra>
